<compile_context>
chip_gen: v6e
topology: v6e:2x2x1
jax: 0.10.0
libtpu: 0.0.40
codegen_flags: <defaults>
</compile_context>

<pallas_src>
import functools
import math

import jax
import jax.numpy as jnp
from jax.experimental import pallas as pl
from jax.experimental.pallas import tpu as pltpu


def _b_net_kernel(t_ref, ph_ref, po_ref, o_ref, *, hid_dim, cos_len):
    """Single-shot fused forward.

    t_ref : (B, 1) f32
    ph_ref: packed hid-lane slab, rows:
              [0:12]           W1' = emb @ w1
              [12]             b1
              [13]             b2
              [14]             wt1 (row of the (1, hid) t-projection)
              [15]             bt1
              [16]             periodic mask (1.0 = cos unit, 0.0 = relu unit)
              [17:24]          zero padding (keeps w2 8-sublane aligned)
              [24:24+hid]      w2
    po_ref: packed output-lane slab, rows:
              [0:2*hid]        W_out = concat([w3, wt2], axis=0)
              [2*hid]          b_out = b3 + bt2
    """
    t = t_ref[...]                                   # (B, 1) f32
    B = t.shape[0]

    # ---- carve static views out of the packed slabs (zero-cost) --------
    w1p = ph_ref[0:12, :]                            # (12, hid)
    b1 = ph_ref[12:13, :]                            # (1, hid)
    b2 = ph_ref[13:14, :]                            # (1, hid)
    wt1 = ph_ref[14:15, :]                           # (1, hid)
    bt1 = ph_ref[15:16, :]                           # (1, hid)
    mask = ph_ref[16:17, :]                          # (1, hid)
    w2 = ph_ref[24:24 + hid_dim, :]                  # (hid, hid)

    w_out = po_ref[0:2 * hid_dim, :]                 # (2*hid, out)
    b_out = po_ref[2 * hid_dim:2 * hid_dim + 1, :]   # (1, out)

    # ---- month index: (t % 12).to(int64), clamped to valid range -------
    m_idx = jnp.clip(jnp.mod(t, 12.0).astype(jnp.int32), 0, 11)     # (B, 1)
    lane = jax.lax.broadcasted_iota(jnp.int32, (B, 12), 1)
    onehot = (lane == m_idx).astype(jnp.float32)                    # (B, 12)

    # ---- m_encoder (embedding folded into first layer) -----------------
    h = jnp.dot(onehot, w1p, preferred_element_type=jnp.float32) + b1
    h = jnp.maximum(h, 0.0)
    h = jnp.dot(h, w2, preferred_element_type=jnp.float32) + b2
    h = jnp.maximum(h, 0.0)                                         # (B, hid)

    # ---- t_encoder: first layer is a VPU broadcast (no K=1 matmul) -----
    ht = t * wt1 + bt1                                              # (B, hid)
    periodic = jnp.cos((2.0 * math.pi / cos_len) * ht)              # EUP slot
    nonperiodic = jnp.maximum(ht, 0.0)
    ht = jnp.where(mask > 0.5, periodic, nonperiodic)               # (B, hid)

    # ---- fused output projection: xm + xt in one MXU pass --------------
    hcat = jnp.concatenate([h, ht], axis=-1)                        # (B, 2*hid)
    o_ref[...] = jnp.dot(hcat, w_out,
                         preferred_element_type=jnp.float32) + b_out


def pack_params(params, n_periodic):
    """One-time wrapper-side packing: fold emb@w1, fuse output heads, build
    the two contiguous slabs the kernel consumes (amortised across calls)."""
    hid = params["w2"].shape[0]

    w1p = jnp.dot(params["emb"], params["w1"])                      # (12, hid)
    mask = (jnp.arange(hid) < n_periodic).astype(jnp.float32)[None, :]

    hid_slab = jnp.concatenate(
        [
            w1p,                                   # rows 0:12
            params["b1"],                          # row 12
            params["b2"],                          # row 13
            params["wt1"],                         # row 14   (wt1 is (1, hid))
            params["bt1"],                         # row 15
            mask,                                  # row 16
            jnp.zeros((7, hid), jnp.float32),      # rows 17:24 (alignment pad)
            params["w2"],                          # rows 24:24+hid
        ],
        axis=0,
    )                                              # (24 + hid, hid)

    out_slab = jnp.concatenate(
        [
            params["w3"],                          # rows 0:hid
            params["wt2"],                         # rows hid:2*hid
            params["b3"] + params["bt2"],          # row 2*hid
        ],
        axis=0,
    )                                              # (2*hid + 1, out)
    return hid_slab, out_slab


def b_net_forward(t, hid_slab, out_slab, *, hid_dim, output_dim, cos_len):
    """t: (B, 1) f32 -> (B, output_dim) f32.  Slabs come from pack_params."""
    B = t.shape[0]
    vmem = pl.BlockSpec(memory_space=pltpu.MemorySpace.VMEM)
    return pl.pallas_call(
        functools.partial(_b_net_kernel, hid_dim=hid_dim, cos_len=cos_len),
        out_shape=jax.ShapeDtypeStruct((B, output_dim), jnp.float32),
        in_specs=[vmem, vmem, vmem],
        out_specs=vmem,
    )(t, hid_slab, out_slab)
    # NOTE: at these sizes the kernel is launch/DMA-latency bound; for a large
    # batch add a 1-D "parallel" grid over B (2 TCs on v7x) and pad output_dim
    # to 128 lanes for unmasked stores — unnecessary at B=8.


def init_params(key, m_embed_dim, hid_dim, output_dim):
    ks = jax.random.split(key, 12)

    def lin(kw, kb, fan_in, fan_out):
        bound = 1.0 / math.sqrt(fan_in)
        w = jax.random.uniform(kw, (fan_in, fan_out), jnp.float32, -bound, bound)
        b = jax.random.uniform(kb, (1, fan_out), jnp.float32, -bound, bound)
        return w, b

    emb = jax.random.normal(ks[0], (12, m_embed_dim), jnp.float32)
    w1, b1 = lin(ks[1], ks[2], m_embed_dim, hid_dim)
    w2, b2 = lin(ks[3], ks[4], hid_dim, hid_dim)
    w3, b3 = lin(ks[5], ks[6], hid_dim, output_dim)
    wt1, bt1 = lin(ks[7], ks[8], 1, hid_dim)
    wt2, bt2 = lin(ks[9], ks[10], hid_dim, output_dim)
    return dict(emb=emb, w1=w1, b1=b1, w2=w2, b2=b2, w3=w3, b3=b3,
                wt1=wt1, bt1=bt1, wt2=wt2, bt2=bt2)


if __name__ == "__main__":
    # Small, forward-consistent shapes (B multiple of 8 = f32 sublane tile).
    B = 8
    m_embed_dim = 16
    hid_dim = 32
    output_dim = 16
    cos_len = 12.0
    periodic_ratio = 0.25
    n_periodic = int(hid_dim * periodic_ratio)

    key = jax.random.PRNGKey(0)
    k_param, k_t = jax.random.split(key)
    params = init_params(k_param, m_embed_dim, hid_dim, output_dim)

    # Pack once (folds emb@w1, fuses output heads, bakes the periodic mask).
    hid_slab, out_slab = pack_params(params, n_periodic)
    hid_slab = jax.block_until_ready(hid_slab)
    out_slab = jax.block_until_ready(out_slab)

    # t is a nonnegative "time" input of shape (B, 1), like the module expects.
    t = jax.random.uniform(k_t, (B, 1), jnp.float32, 0.0, 48.0)

    out = b_net_forward(t, hid_slab, out_slab,
                        hid_dim=hid_dim, output_dim=output_dim, cos_len=cos_len)
    out = jax.block_until_ready(out)
    assert out.shape == (B, output_dim)
    print("KERNEL_OK")
</pallas_src>

<mosaic_0001>
module attributes {stable_mosaic.version = 11 : i64} {
  func.func @_b_net_kernel(%arg0: memref<8x1xf32, #tpu.memory_space<vmem>>, %arg1: memref<56x32xf32, #tpu.memory_space<vmem>>, %arg2: memref<65x16xf32, #tpu.memory_space<vmem>>, %arg3: memref<8x16xf32, #tpu.memory_space<vmem>>) attributes {dimension_semantics = [], scalar_prefetch = 0 : i64, scratch_operands = 0 : i64, tpu.core_type = #tpu.core_type<tc>} {
    %c0 = arith.constant 0 : index
    %c0_0 = arith.constant 0 : index
    %0 = vector.load %arg0[%c0, %c0_0] : memref<8x1xf32, #tpu.memory_space<vmem>>, vector<8x1xf32>
    %c0_1 = arith.constant 0 : index
    %c0_2 = arith.constant 0 : index
    %1 = vector.load %arg1[%c0_1, %c0_2] : memref<56x32xf32, #tpu.memory_space<vmem>>, vector<12x32xf32>
    %c12 = arith.constant 12 : index
    %c0_3 = arith.constant 0 : index
    %2 = vector.load %arg1[%c12, %c0_3] : memref<56x32xf32, #tpu.memory_space<vmem>>, vector<1x32xf32>
    %c13 = arith.constant 13 : index
    %c0_4 = arith.constant 0 : index
    %3 = vector.load %arg1[%c13, %c0_4] : memref<56x32xf32, #tpu.memory_space<vmem>>, vector<1x32xf32>
    %c14 = arith.constant 14 : index
    %c0_5 = arith.constant 0 : index
    %4 = vector.load %arg1[%c14, %c0_5] : memref<56x32xf32, #tpu.memory_space<vmem>>, vector<1x32xf32>
    %c15 = arith.constant 15 : index
    %c0_6 = arith.constant 0 : index
    %5 = vector.load %arg1[%c15, %c0_6] : memref<56x32xf32, #tpu.memory_space<vmem>>, vector<1x32xf32>
    %c16 = arith.constant 16 : index
    %c0_7 = arith.constant 0 : index
    %6 = vector.load %arg1[%c16, %c0_7] : memref<56x32xf32, #tpu.memory_space<vmem>>, vector<1x32xf32>
    %c24 = arith.constant 24 : index
    %c0_8 = arith.constant 0 : index
    %7 = vector.load %arg1[%c24, %c0_8] : memref<56x32xf32, #tpu.memory_space<vmem>>, vector<32x32xf32>
    %c0_9 = arith.constant 0 : index
    %c0_10 = arith.constant 0 : index
    %8 = vector.load %arg2[%c0_9, %c0_10] : memref<65x16xf32, #tpu.memory_space<vmem>>, vector<64x16xf32>
    %c64 = arith.constant 64 : index
    %c0_11 = arith.constant 0 : index
    %9 = vector.load %arg2[%c64, %c0_11] : memref<65x16xf32, #tpu.memory_space<vmem>>, vector<1x16xf32>
    %cst = arith.constant 1.200000e+01 : f32
    %10 = vector.broadcast %cst : f32 to vector<8x1xf32>
    %11 = arith.remf %0, %10 : vector<8x1xf32>
    %cst_12 = arith.constant 0.000000e+00 : f32
    %12 = vector.broadcast %cst_12 : f32 to vector<8x1xf32>
    %13 = arith.cmpf one, %11, %12 : vector<8x1xf32>
    %cst_13 = arith.constant 0.000000e+00 : f32
    %14 = vector.broadcast %cst_13 : f32 to vector<8x1xf32>
    %15 = arith.cmpf olt, %11, %14 : vector<8x1xf32>
    %cst_14 = arith.constant 0.000000e+00 : f32
    %16 = arith.cmpf olt, %cst, %cst_14 : f32
    %17 = vector.broadcast %16 : i1 to vector<8x1xi1>
    %18 = vector.broadcast %17 : vector<8x1xi1> to vector<8x1xi1>
    %19 = arith.xori %15, %18 : vector<8x1xi1>
    %20 = arith.andi %19, %13 : vector<8x1xi1>
    %21 = vector.broadcast %cst : f32 to vector<8x1xf32>
    %22 = arith.addf %11, %21 : vector<8x1xf32>
    %23 = arith.select %20, %22, %11 : vector<8x1xi1>, vector<8x1xf32>
    %24 = arith.fptosi %23 : vector<8x1xf32> to vector<8x1xi32>
    %c0_i32 = arith.constant 0 : i32
    %c11_i32 = arith.constant 11 : i32
    %25 = vector.broadcast %c0_i32 : i32 to vector<8x1xi32>
    %26 = arith.maxsi %25, %24 : vector<8x1xi32>
    %27 = vector.broadcast %c11_i32 : i32 to vector<8x1xi32>
    %28 = arith.minsi %27, %26 : vector<8x1xi32>
    %29 = tpu.iota {dimensions = array<i32: 1>} : vector<8x12xi32>
    %30 = vector.broadcast %28 : vector<8x1xi32> to vector<8x12xi32>
    %31 = arith.cmpi eq, %29, %30 : vector<8x12xi32>
    %32 = arith.extui %31 : vector<8x12xi1> to vector<8x12xi32>
    %33 = arith.sitofp %32 : vector<8x12xi32> to vector<8x12xf32>
    %cst_15 = arith.constant dense<0.000000e+00> : vector<8x32xf32>
    %34 = tpu.matmul %33, %1, %cst_15 {dimension_numbers = #tpu.dot_dimension_numbers<[1], [0], [0], [1], [0, 0, 1, 1], [], []>} : vector<8x12xf32>, vector<12x32xf32>, vector<8x32xf32> -> vector<8x32xf32>
    %35 = vector.broadcast %2 : vector<1x32xf32> to vector<8x32xf32>
    %36 = arith.addf %34, %35 : vector<8x32xf32>
    %cst_16 = arith.constant 0.000000e+00 : f32
    %37 = vector.broadcast %cst_16 : f32 to vector<8x32xf32>
    %38 = arith.maximumf %36, %37 : vector<8x32xf32>
    %cst_17 = arith.constant dense<0.000000e+00> : vector<8x32xf32>
    %39 = tpu.matmul %38, %7, %cst_17 {dimension_numbers = #tpu.dot_dimension_numbers<[1], [0], [0], [1], [0, 0, 1, 1], [], []>} : vector<8x32xf32>, vector<32x32xf32>, vector<8x32xf32> -> vector<8x32xf32>
    %40 = vector.broadcast %3 : vector<1x32xf32> to vector<8x32xf32>
    %41 = arith.addf %39, %40 : vector<8x32xf32>
    %cst_18 = arith.constant 0.000000e+00 : f32
    %42 = vector.broadcast %cst_18 : f32 to vector<8x32xf32>
    %43 = arith.maximumf %41, %42 : vector<8x32xf32>
    %44 = vector.broadcast %0 : vector<8x1xf32> to vector<8x32xf32>
    %45 = vector.broadcast %4 : vector<1x32xf32> to vector<8x32xf32>
    %46 = arith.mulf %44, %45 : vector<8x32xf32>
    %47 = vector.broadcast %5 : vector<1x32xf32> to vector<8x32xf32>
    %48 = arith.addf %46, %47 : vector<8x32xf32>
    %cst_19 = arith.constant 0.52359879 : f32
    %49 = vector.broadcast %cst_19 : f32 to vector<8x32xf32>
    %50 = arith.mulf %49, %48 : vector<8x32xf32>
    %51 = math.cos %50 : vector<8x32xf32>
    %cst_20 = arith.constant 0.000000e+00 : f32
    %52 = vector.broadcast %cst_20 : f32 to vector<8x32xf32>
    %53 = arith.maximumf %48, %52 : vector<8x32xf32>
    %cst_21 = arith.constant 5.000000e-01 : f32
    %54 = vector.broadcast %cst_21 : f32 to vector<1x32xf32>
    %55 = arith.cmpf ogt, %6, %54 : vector<1x32xf32>
    %56 = vector.shape_cast %55 : vector<1x32xi1> to vector<1x32xi1>
    %57 = vector.broadcast %56 : vector<1x32xi1> to vector<8x32xi1>
    %58 = arith.select %57, %51, %53 : vector<8x32xi1>, vector<8x32xf32>
    %59 = tpu.concatenate %43, %58 in 1 : vector<8x32xf32>, vector<8x32xf32> -> vector<8x64xf32>
    %cst_22 = arith.constant dense<0.000000e+00> : vector<8x16xf32>
    %60 = tpu.matmul %59, %8, %cst_22 {dimension_numbers = #tpu.dot_dimension_numbers<[1], [0], [0], [1], [0, 0, 1, 1], [], []>} : vector<8x64xf32>, vector<64x16xf32>, vector<8x16xf32> -> vector<8x16xf32>
    %61 = vector.broadcast %9 : vector<1x16xf32> to vector<8x16xf32>
    %62 = arith.addf %60, %61 : vector<8x16xf32>
    %c0_23 = arith.constant 0 : index
    %c0_24 = arith.constant 0 : index
    %63 = vector.load %arg3[%c0_23, %c0_24] : memref<8x16xf32, #tpu.memory_space<vmem>>, vector<8x16xf32>
    tpu.vector_store %arg3[%c0_23, %c0_24], %62 {strides = array<i32>} : memref<8x16xf32, #tpu.memory_space<vmem>>, vector<8x16xf32>,
    return
  }
}

</mosaic_0001>

<bundles_post_ra>
// kernel: tpu_custom_call.1
= control target key start
LH: loop header
LB: loop body
LE: loop exit
PB: predicated region body
PF: predicated region fallthrough
CT: control target
= control target key end

     0   :  { %v57_v1 = vlaneseq  ;;  %vm73_vm0 = vcmask 1043456   ;;  %v566_v3 = vmov 0   ;;  %v567_v5 = vmov 0.0   ;;  %s714_s0 = inlined_call_operand.vmem [shape: f32[8,1], index: 0, kind: input, shape index: {}]   ;;  %s715_s1 = inlined_call_operand.vmem [shape: f32[56,32], index: 1, kind: input, shape index: {}]   ;;  %s716_s2 = inlined_call_operand.vmem [shape: f32[65,16], index: 2, kind: input, shape index: {}]   ;;  %s717_s3 = inlined_call_operand.hbm [shape: f32[8,16], index: 3, kind: output, shape index: {}]  }
   0x1   :  { %v22_v0 = vld [vmem:[%s715_s1 + $0x10] sm:$0x1]  ;;  %v15_v2 = vld [vmem:[%s714_s0] sm:$0xff]  ;;  %539 = vset.pattern.permute.xlu0 %v566_v3  ;;  %485 = vmatprep.subr.mxu1 %v567_v5  ;;  %v17_v6 = vld [vmem:[%s715_s1 + $0x8] sm:$0xf] }
   0x2   :  { %vm347_vm1 = vcmp.gt.f32.partialorder %v22_v0, 0.5  ;;  %v36_v4 = vand.u32 2147483647, %v15_v2  ;;  %v350_v7 = vshrl.u32 %v57_v1, 7  ;;  %486 = vmatpush3.msk.msra.mxu1 %vm73_vm0, %v17_v6  ;;  %503 = vmatprep.subr.mxu0 %v567_v5 }
   0x3   :  { %8 = vsyncpa [#allocation3], 0  ;;  %v348_v8 = vsel %vm347_vm1, 1, %v566_v3  ;;  %487 = vmatprep.subr.mxu1 %v567_v5  ;;  %v45_v15 = vand.u32 2147483648, %v15_v2  ;;  %v16_v23 = vld [vmem:[%s715_s1] sm:$0xff]  ;;  %vm568_vm7 = vmmov 0  }
   0x4   :  { %v38_v9 = vmul.f32 0.083333336, %v36_v4  ;;  %v351_v10 = vsub.s32 0, %v350_v7  ;;  %488 = vmatpush3.msra.mxu1 %v16_v23  ;;  %489 = vmatprep.mubr.msk.f32.mxu1 %vm568_vm7, %v567_v5  ;;  %v58_v26 = vand.u32 127, %v57_v1  ;;  %vm69_vm9 = vcmask 97280   ;;  %v26_v28 = vld [vmem:[%s715_s1 + $0x30] sm:$0xff] }
   0x5   :  { %492 = vmatprep.subr.mxu1 %v567_v5  ;;  %519 = vmatprep.mubr.msk.f32.mxu0 %vm568_vm7, %v567_v5  ;;  %v460_v30 = vld [vmem:[%s715_s1 + $0xe] ss:$0 sm:$0xff]  ;;  %v461_v31 = vld [vmem:[%s715_s1 + $0xf] ss:$0 sm:$0xff]  ;;  %v569_v46 = vmov 683565275  }
   0x6   :  { %v39_v11 = vfloor.f32 %v38_v9  ;;  %v609_v12 = vrot.slane %v348_v8, %v351_v10  ;;  %v570_v48 = vmov 2475754826   ;;  %v571_v51 = vmov 2131351028   ;;  %s575_s14 = smov 32   ;;  %s576_s26 = smov [#allocation2]  }
   0x7   :  { %v572_v54 = vmov 2102212464   ;;  %v573_v57 = vmov 920167782   ;;  %v574_v60 = vmov 1326507024  }
   0x8   :  { %v40_v13 = vmul.f32 12.0, %v39_v11  ;;  %s446_s27 = sshll.u32 %s576_s26, 4  ;;  %s447_s27 = int_to_ptr.vmem [resolvable:$true] %s446_s27 }
   0x9   :  { %p549_p1 = scmp.lt.s32.totalorder %s447_s27, %s447_s27 }
   0xa   :  { %v41_v14 = vsub.f32 %v36_v4, %v40_v13 }
   0xc   :  { %vm42_vm2 = vcmp.eq.f32.partialorder %v41_v14, 12.0 }
   0xd   :  { %v43_v16 = vsel %vm42_vm2, 0.0, %v41_v14 }
   0xe   :  { %v44_v17 = vand.u32 2147483647, %v43_v16 }
  0x10   :  { %v46_v18 = vor.u32 %v45_v15, %v44_v17 }
  0x12   :  { %vm47_vm3 = vcmp.ne.f32.partialorder %v46_v18, 0.0  ;;  %vm48_vm4 = vcmp.lt.f32.partialorder %v46_v18, 0.0  ;;  %v50_v19 = vadd.f32 12.0, %v46_v18 }
  0x13   :  { %vm49_vm5 = vmand %vm48_vm4, %vm47_vm3 }
  0x14   :  { %v51_v20 = vsel %vm49_vm5, %v50_v19, %v46_v18 }
  0x15   :  { %v522_v21 = vtrunc.f32 %v51_v20 }
  0x17   :  { %v523_v22 = vcvt.f32.s32 %v522_v21 }
  0x19   :  { %vm53_vm6 = vcmp.gt.s32.totalorder %v523_v22, 0 }
  0x1a   :  { %v54_v24 = vsel %vm53_vm6, %v523_v22, 0 }
  0x1b   :  { %vm55_vm8 = vcmp.lt.s32.totalorder %v54_v24, 11 }
  0x1c   :  { %v56_v25 = vsel %vm55_vm8, %v54_v24, 11 }
  0x1d   :  { %60 = vperm.xlu0 %539, %v56_v25  }
  0x21   :  { %229 = vperm.xlu0 %539, %v15_v2  }
  0x98   :  { %v61_v27 = vpop.permute.xlu0 %60 }
  0x99   :  { %vm62_vm10 = vcmp.eq.s32.totalorder %v58_v26, %v61_v27 }
  0x9a   :  { %v454_v29 = vsel %vm62_vm10, 1.0, %v567_v5  ;;  %vm364_vm10 = vcmask 523264  }
  0x9b   :  { %490 = vmatmul.mubr.msk.f32.vlgmr.msra.gmra.mxu1 %vm69_vm9, %v454_v29  ;;  %vm152_vm9 = vcmask 261120  }
  0x9c   :  { %v230_v32 = vpop.permute.xlu0 %229  ;;  %493 = vmatpush3.msra.mxu1 %v26_v28  ;;  %500 = vmatprep.mubr.msk.f32.mxu1 %vm568_vm7, %v567_v5  ;;  %vm353_vm7 = vcmp.eq.s32.totalorder %v609_v12, 1 }
  0x9d   :  { %v236_v33 = vmul.f32 %v460_v30, %v230_v32  ;;  %494 = vmatprep.subr.mxu1 %v567_v5 }
  0x9f   :  { %v632_v34 = vadd.f32 %v461_v31, %v236_v33 }
  0xa1   :  { %v635_v35 = vmul.f32 0.5235988, %v632_v34 }
  0xa3   :  { %v246_v36 = vand.u32 2139095040, %v635_v35  ;;  %v243_v40 = vand.u32 2147483647, %v635_v35  ;;  %vm245_vm2 = vcmp.lt.s32.totalorder %v635_v35, 0  ;;  %vm335_vm8 = vweird.f32 %v635_v35 }
  0xa5   :  { %v247_v37 = vshrl.u32 %v246_v36, 23  ;;  %v250_v44 = vand.u32 8388607, %v243_v40  ;;  %vm244_vm3 = vcmp.le.f32.partialorder %v243_v40, 0.7853982  ;;  %v32_v40 = vld [vmem:[%s716_s2 + $0x28] sm:$0xff] }
  0xa7   :  { %v462_v38 = vadd.s32 4294967169, %v247_v37  ;;  %v251_v62 = vor.u32 8388608, %v250_v44 }
  0xa9   :  { %v253_v39 = vadd.s32 1, %v462_v38  ;;  %v291_v14 = vshll.u32 %v251_v62, 8 }
  0xab   :  { %vm254_vm11 = vcmp.gt.s32.totalorder %v253_v39, 0 }
  0xac   :  { %v255_v41 = vsel %vm254_vm11, %v253_v39, 0  ;;  %vm438_vm11 = vcmask 130048  }
  0xad   :  { %v257_v42 = vand.u32 31, %v255_v41  ;;  %v256_v45 = vshrl.u32 %v255_v41, 5 }
  0xaf   :  { %v258_v43 = vsub.s32 32, %v257_v42  ;;  %v260_v47 = vshll.u32 %v569_v46, %v257_v42  ;;  %v263_v49 = vshll.u32 %v570_v48, %v257_v42  ;;  %v266_v53 = vshll.u32 %v571_v51, %v257_v42 }
  0xb0   :  { %v269_v56 = vshll.u32 %v572_v54, %v257_v42  ;;  %v272_v59 = vshll.u32 %v573_v57, %v257_v42  ;;  %vm275_vm12 = vcmp.lt.s32.totalorder %v256_v45, 1  ;;  %vm278_vm13 = vcmp.lt.s32.totalorder %v256_v45, 4 }
  0xb1   :  { %v261_v50 = vshrl.u32 %v570_v48, %v258_v43  ;;  %v264_v52 = vshrl.u32 %v571_v51, %v258_v43  ;;  %v267_v55 = vshrl.u32 %v572_v54, %v258_v43  ;;  %v270_v58 = vshrl.u32 %v573_v57, %v258_v43  ;;  %v25_v51 = vld [vmem:[%s715_s1 + $0x28] sm:$0xff]  ;;  %v23_v54 = vld [vmem:[%s715_s1 + $0x18] sm:$0xff] }
  0xb2   :  { %v273_v61 = vshrl.u32 %v574_v60, %v258_v43  ;;  %v259_v8 = vshrl.u32 %v569_v46, %v258_v43  ;;  %vm277_vm14 = vcmp.lt.s32.totalorder %v256_v45, 3  ;;  %vm276_vm15 = vcmp.lt.s32.totalorder %v256_v45, 2  ;;  %495 = vmatpush3.msra.mxu1 %v25_v51  ;;  %v34_v60 = vld [vmem:[%s716_s2 + $0x38] sm:$0xff] }
  0xb3   :  { %v262_v63 = vor.u32 %v261_v50, %v260_v47  ;;  %v265_v0 = vor.u32 %v264_v52, %v263_v49  ;;  %v268_v1 = vor.u32 %v267_v55, %v266_v53  ;;  %v271_v2 = vor.u32 %v270_v58, %v269_v56  ;;  %v24_v53 = vld [vmem:[%s715_s1 + $0x20] sm:$0xff]  ;;  %496 = vmatprep.subr.mxu1 %v567_v5 }
  0xb4   :  { %v274_v3 = vor.u32 %v273_v61, %v272_v59  ;;  %497 = vmatpush3.msra.mxu1 %v24_v53  ;;  %v33_v61 = vld [vmem:[%s716_s2 + $0x30] sm:$0xff]  ;;  %504 = vmatpush3.msra.mxu0 %v34_v60 }
  0xb5   :  { %v280_v4 = vsel %vm278_vm13, %v268_v1, 2102212464  ;;  %v283_v6 = vsel %vm275_vm12, %v262_v63, %v265_v0  ;;  %v287_v7 = vsel %vm275_vm12, %v265_v0, %v268_v1  ;;  %v284_v9 = vsel %vm278_vm13, %v271_v2, 920167782  ;;  %498 = vmatprep.subr.mxu1 %v567_v5  ;;  %505 = vmatprep.subr.mxu0 %v567_v5 }
  0xb6   :  { %v288_v10 = vsel %vm278_vm13, %v274_v3, 1326507024  ;;  %v285_v11 = vsel %vm277_vm14, %v268_v1, %v284_v9  ;;  %v279_v15 = vsel %vm275_vm12, %v259_v8, %v262_v63  ;;  %v281_v16 = vsel %vm277_vm14, %v265_v0, %v280_v4  ;;  %499 = vmatpush3.msra.mxu1 %v23_v54  ;;  %506 = vmatpush3.msra.mxu0 %v33_v61  ;;  %v31_v0 = vld [vmem:[%s716_s2 + $0x20] sm:$0xff] }
  0xb7   :  { %v289_v13 = vsel %vm277_vm14, %v271_v2, %v288_v10  ;;  %v286_v17 = vsel %vm276_vm15, %v283_v6, %v285_v11  ;;  %v282_v23 = vsel %vm276_vm15, %v279_v15, %v281_v16  ;;  %507 = vmatprep.subr.mxu0 %v567_v5  ;;  %v30_v2 = vld [vmem:[%s716_s2 + $0x18] sm:$0xff]  ;;  %v346_v9 = vmax.f32 %v632_v34, 0.0  ;;  %v29_v34 = vld [vmem:[%s716_s2 + $0x10] sm:$0xff] }
  0xb8   :  { %v290_v18 = vsel %vm276_vm15, %v287_v7, %v289_v13  ;;  %v644_v21 = vmul.u32.u64.low %v291_v14, %v286_v17  ;;  %v645_v22 = vmul.u32.u64.high %v291_v14, %v286_v17, %v644_v21  ;;  %v298_v25 = vmul.u32 %v291_v14, %v282_v23  ;;  %508 = vmatpush3.msra.mxu0 %v32_v40 }
  0xb9   :  { %v641_v19 = vmul.u32.u64.low %v291_v14, %v290_v18  ;;  %v642_v20 = vmul.u32.u64.high %v291_v14, %v290_v18, %v641_v19  ;;  %509 = vmatprep.subr.mxu0 %v567_v5  ;;  %v455_v14 = vld [vmem:[%s715_s1 + $0xc] ss:$0 sm:$0xff]  ;;  %v27_v18 = vld [vmem:[%s716_s2] sm:$0xff] }
  0xba   :  { %v301_v24 = vadd.s32 1, %v645_v22  ;;  %510 = vmatpush3.msra.mxu0 %v31_v0  ;;  %v458_v19 = vld [vmem:[%s715_s1 + $0xd] ss:$0 sm:$0xff]  ;;  %s544_s1 = scalar_lea.vmem %s447_s27, 128 }
  0xbb   :  { %vm300_vm0 = vc.u32 %v642_v20, %v644_v21  ;;  %v299_v39 = vadd.s32 %v644_v21, %v642_v20  ;;  %511 = vmatprep.subr.mxu0 %v567_v5  ;;  %p545_p0 = scmp.ne.s32.totalorder %s447_s27, %s544_s1  ;;  %p550_p2 = scmp.lt.s32.totalorder %s544_s1, %s544_s1 }
  0xbc   :  { %v302_v26 = vsel %vm300_vm0, %v301_v24, %v645_v22  ;;  %512 = vmatpush3.msra.mxu0 %v30_v2 }
  0xbd   :  { %v303_v27 = vadd.s32 %v302_v26, %v298_v25  ;;  %513 = vmatprep.subr.mxu0 %v567_v5  ;;  %v466_v26 = vld [vmem:[%s716_s2 + $0x40] ss:$0 sm:$0xff]  ;;  %p551_p3 = por %p550_p2, %p549_p1 }
  0xbe   :  { %514 = vmatpush3.msra.mxu0 %v29_v34 }
  0xbf   :  { %v304_v28 = vadd.s32 536870912, %v303_v27  ;;  %515 = vmatprep.subr.mxu0 %v567_v5  ;;  %p552_p4 = pnand %p551_p3, %p545_p0 }
  0xc1   :  { %v305_v29 = vshrl.u32 %v304_v28, 30 }
  0xc3   :  { %v306_v30 = vshll.u32 %v305_v29, 30  ;;  %v329_v58 = vsub.s32 4, %v305_v29 }
  0xc5   :  { %v307_v31 = vsub.s32 %v303_v27, %v306_v30  ;;  %v330_v59 = vsel %vm245_vm2, %v329_v58, %v305_v29 }
  0xc6   :  { %v332_v62 = vsel %vm244_vm3, 0, %v330_v59 }
  0xc7   :  { %v309_v32 = vsub.s32 0, %v307_v31  ;;  %v336_v63 = vand.u32 3, %v332_v62 }
  0xc9   :  { %v463_v33 = vmin.u32 %v309_v32, %v307_v31  ;;  %vm341_vm4 = vcmp.eq.s32.totalorder %v336_v63, 2  ;;  %vm338_vm5 = vcmp.eq.s32.totalorder %v336_v63, 0  ;;  %vm337_vm6 = vcmp.lt.s32.totalorder %v336_v63, 2 }
  0xcb   :  { %v311_v36 = vclz %v463_v33 }
  0xcd   :  { %v464_v37 = vadd.s32 4294967294, %v311_v36 }
  0xcf   :  { %vm465_vm1 = vcmp.lt.s32.totalorder %v464_v37, 0 }
  0xd0   :  { %v314_v38 = vsel %vm465_vm1, 0, %v464_v37 }
  0xd1   :  { %v315_v41 = vsub.s32 32, %v314_v38  ;;  %v319_v42 = vsub.s32 4294967266, %v314_v38  ;;  %v316_v43 = vshll.u32 %v307_v31, %v314_v38 }
  0xd3   :  { %v317_v44 = vshrl.u32 %v299_v39, %v315_v41  ;;  %v320_v45 = vadd.s32 127, %v319_v42 }
  0xd5   :  { %v318_v46 = vor.u32 %v317_v44, %v316_v43  ;;  %v321_v47 = vshll.u32 %v320_v45, 23 }
  0xd7   :  { %v322_v48 = vor.u32 4788187, %v321_v47  ;;  %v325_v50 = vcvt.s32.f32 %v318_v46 }
  0xd9   :  { %v323_v49 = vand.u32 2147483647, %v322_v48 }
  0xdb   :  { %v326_v52 = vmul.f32 %v325_v50, %v323_v49 }
  0xdd   :  { %v327_v55 = vxor.u32 2147483648, %v326_v52 }
  0xdf   :  { %v328_v56 = vsel %vm245_vm2, %v327_v55, %v326_v52 }
  0xe0   :  { %v331_v57 = vsel %vm244_vm3, %v635_v35, %v328_v56  ;;  %v28_v35 = vld [vmem:[%s716_s2 + $0x8] sm:$0xff] }
  0xe1   :  { %540 = vcosq.f32 %v331_v57  ;;  %516 = vmatpush3.msra.mxu0 %v28_v35 }
  0xe2   :  { %542 = vsinq.f32 %v331_v57  ;;  %517 = vmatprep.subr.mxu0 %v567_v5 }
  0xe3   :  { %518 = vmatpush3.msra.mxu0 %v27_v18 }
  0xee   :  { %v541_v1 = vpop.eup %540 }
  0xef   :  { %v543_v3 = vpop.eup %542  ;;  %v342_v4 = vxor.u32 2147483648, %v541_v1 }
  0xf0   :  { %v339_v6 = vxor.u32 2147483648, %v543_v3 }
  0xf1   :  { %v343_v7 = vsel %vm341_vm4, %v342_v4, %v543_v3 }
  0xf2   :  { %v340_v8 = vsel %vm338_vm5, %v541_v1, %v339_v6 }
  0xf3   :  { %v344_v10 = vsel %vm337_vm6, %v340_v8, %v343_v7 }
  0xf4   :  { %v345_v11 = vsel %vm335_vm8, nan, %v344_v10 }
  0xf5   :  { %v354_v13 = vsel %vm353_vm7, %v345_v11, %v346_v9 }
  0xf6   :  { %356 = vrot.lane.b32.xlu1 %v354_v13, %s575_s14 }
 0x15b   :  { %v143_v15 = vpop.f32.mrf.mxu1 }
 0x15c   :  { %v144_v16 = vadd.f32 %v455_v14, %v143_v15 }
 0x15d   :  { %v491_v17 = vpop.f32.mrf.mxu1 }
 0x15e   :  { %v147_v12 = vmax.f32 %v144_v16, 0.0 }
 0x160   :  { %501 = vmatmul.mubr.msk.f32.vlgmr.msra.gmra.mxu1 %vm152_vm9, %v147_v12 }
 0x168   :  { %v357_v24 = vpop.permute.xlu1 %356 }
 0x220   :  { %v222_v20 = vpop.f32.mrf.mxu1 }
 0x221   :  { %v223_v21 = vadd.f32 %v458_v19, %v222_v20 }
 0x222   :  { %v502_v22 = vpop.f32.mrf.mxu1 }
 0x223   :  { %v226_v23 = vmax.f32 %v223_v21, 0.0 }
 0x225   :  { %v359_v25 = vsel %vm152_vm9, %v226_v23, %v357_v24 }
 0x226   :  { %520 = vmatmul.mubr.msk.f32.vlgmr.msra.gmra.mxu0 %vm364_vm10, %v359_v25 }
 0x2e6   :  { %v434_v5 = vpop.f32.mrf.mxu0 }
 0x2e7   :  { %v435_v27 = vadd.f32 %v466_v26, %v434_v5 }
 0x2e8   :  { %v521_v28 = vpop.f32.mrf.mxu0 }
 0x2e9   :  { %439 = vst.msk [vmem:[#allocation2] sm:$0xff] %vm438_vm11, %v435_v27 }
 0x2ea   :  { %555 = shalt.err (!%p552_p4)
}
 0x2eb   :  { %449 = dma.vmem_to_hbm [thread:$0]  %s447_s27, 128, %s717_s3, [#allocation3]  }
 0x2ec   :  { %564 = dma.done.wait [#allocation3], 128  }
 0x2ed   :  { %565 = vsyncadd [#allocation3], 4294967168 }
 0x2ee   :  { %453 = vsyncpa [#allocation3], 1 }

</bundles_post_ra>
